<compile_context>
chip_gen: v7x
topology: tpu7x:2x2x1
jax: 0.10.0
libtpu: 0.0.40
codegen_flags: <defaults>
</compile_context>

<pallas_src>
import math
from functools import partial

import jax
import jax.numpy as jnp
from jax.experimental import pallas as pl
from jax.experimental.pallas import tpu as pltpu


C_PAD = 128  # lane-dense output / param width


# ----------------------------- Pallas kernel -----------------------------

def _textcnn_kernel(L, TS, E, GP, max_k, emb_ref, w_ref, p_ref, out_ref):
    """
    emb_ref : (L, TS, E)          bf16 embeddings; L = conv length axis (torch batch),
                                  TS = seq tile (the parallel grid axis)
    w_ref   : (E + GP, max_k*GP)  bf16 weight slab:
                rows [0, E)       conv taps, tap-major / branch-minor, zero-padded
                rows [E, E+GP)    fc weight (transposed) in cols [0, C_PAD)
    p_ref   : (3, C_PAD)          f32 params: row0 conv bias, row1 last valid conv
                                  position per feature column, row2 fc bias
    out_ref : (TS, C_PAD)         f32
    """
    x = emb_ref[...].reshape(L * TS, E)                              # bf16

    # One MXU matmul covering every tap of every branch (bf16 in, f32 accum).
    # NOTE: K = E underfills the systolic array at toy sizes; pad E toward
    # 128/256 (or im2col per branch) if this ever becomes MXU-bound.
    t = jnp.dot(x, w_ref[0:E, :], preferred_element_type=jnp.float32)  # (L*TS, max_k*GP)

    # Align tap j onto tap 0 with a sublane roll of j*TS rows (XLU), then add
    # full-width (VPU).  Branches with < max_k taps have zero weight columns,
    # so the surplus rolled terms contribute zeros; wrap-around rows land only
    # on conv positions that the pooling mask discards.
    acc = t[:, 0:GP]
    for j in range(1, max_k):
        tj = t[:, j * GP:(j + 1) * GP]                               # 64-lane-aligned slice
        acc = acc + pltpu.roll(tj, (L - j) * TS, axis=0)             # == shift by -j*TS

    # Max-pool over conv positions (row blocks of TS).  Positions past a
    # branch's last valid index are masked to -1e30; bias + ReLU commute with
    # the max and are applied once afterwards.  Pairwise tree keeps the
    # dependency chain at ~log2(L).
    lastp = p_ref[1:2, 0:GP]                                         # (1, GP) f32
    blocks = []
    for p in range(L):
        blk = acc[p * TS:(p + 1) * TS, :]
        if p > L - max_k:                                            # only tail positions need masking
            blk = jnp.where(lastp >= float(p), blk, jnp.float32(-1e30))
        blocks.append(blk)
    while len(blocks) > 1:
        nxt = [jnp.maximum(blocks[2 * i], blocks[2 * i + 1])
               for i in range(len(blocks) // 2)]
        if len(blocks) % 2:
            nxt.append(blocks[-1])
        blocks = nxt
    pooled = blocks[0]                                               # (TS, GP)

    feat = jnp.maximum(pooled + p_ref[0:1, 0:GP], 0.0)               # bias + ReLU, f32

    # Fused FC matmul into a lane-dense (TS, 128) store (unmasked vst).
    out = jnp.dot(feat.astype(jnp.bfloat16), w_ref[E:E + GP, 0:C_PAD],
                  preferred_element_type=jnp.float32)
    out_ref[...] = (out + p_ref[2:3, :]).astype(out_ref.dtype)


# ----------------------------- wrapper -----------------------------

def textcnn_forward_pallas(tokens, emb_table, conv_params, wfc, bfc, kernel_sizes):
    """tokens: (B, S) int32.  Returns (S, num_classes) float32 (torch semantics)."""
    B, S = tokens.shape                    # B = torch batch = Conv1d length axis
    L = B
    _, E = emb_table.shape
    F = conv_params[0][0].shape[0]
    C = wfc.shape[0]
    n = len(kernel_sizes)
    max_k = max(kernel_sizes)
    nF = n * F
    GP = ((nF + 63) // 64) * 64            # per-tap group width, half-lane-tile aligned
    NT = max_k * GP
    assert L >= max_k and C <= C_PAD and nF <= GP

    # Seq tile = parallel grid axis (conv slides over L only, so seq blocks are
    # fully independent).  Sized so 2x(emb block + t block + weights) stays far
    # under the 32 MiB scoped VMEM budget (v7x-safe).
    TS = S if S <= 128 else 128
    assert S % TS == 0 and TS % 8 == 0

    # Embedding gather (data-dependent row gather) stays in plain JAX; the slab
    # handed to the kernel is bf16 (half the HBM traffic of f32).
    # TODO(synk): for production sizes, move the gather in-kernel via a
    # scalar-prefetched token table + per-row DMA gather (memory_space=pl.ANY).
    emb3 = emb_table[tokens].astype(jnp.bfloat16)                    # (L, S, E)

    # Weight slab (one bf16 DMA): conv taps tap-major/branch-minor with zero
    # padding, fc weight stacked underneath.
    wslab = jnp.zeros((E + GP, NT), jnp.float32)
    for i, (k, (w, _)) in enumerate(zip(kernel_sizes, conv_params)):  # w: (F, E, k)
        for j in range(k):
            wslab = wslab.at[0:E, j * GP + i * F: j * GP + (i + 1) * F].set(w[:, :, j].T)
    wslab = wslab.at[E:E + nF, 0:C].set(wfc.T)
    wslab = wslab.astype(jnp.bfloat16)

    # Param slab (one f32 DMA): conv bias / last-valid conv position / fc bias.
    params = jnp.zeros((3, C_PAD), jnp.float32)
    params = params.at[0, 0:nF].set(jnp.concatenate([b for (_, b) in conv_params]))
    params = params.at[1, :].set(float(L - 1))                       # pad cols: never masked
    for i, k in enumerate(kernel_sizes):
        params = params.at[1, i * F:(i + 1) * F].set(float(L - k))
    params = params.at[2, 0:C].set(bfc)

    kernel = partial(_textcnn_kernel, L, TS, E, GP, max_k)

    out_full = pl.pallas_call(
        kernel,
        out_shape=jax.ShapeDtypeStruct((S, C_PAD), jnp.float32),
        grid=(S // TS,),
        in_specs=[
            pl.BlockSpec((L, TS, E), lambda i: (0, i, 0)),
            pl.BlockSpec((E + GP, NT), lambda i: (0, 0)),
            pl.BlockSpec((3, C_PAD), lambda i: (0, 0)),
        ],
        out_specs=pl.BlockSpec((TS, C_PAD), lambda i: (i, 0)),
        compiler_params=pltpu.CompilerParams(
            dimension_semantics=("parallel",),
            vmem_limit_bytes=32 * 1024 * 1024),
    )(emb3, wslab, params)

    return out_full[:, :C]


# ----------------------------- pure-JAX reference (f32) -----------------------------

def textcnn_forward_ref(tokens, emb_table, conv_params, wfc, bfc, kernel_sizes):
    B, S = tokens.shape
    x = emb_table[tokens.T]                     # (S, B, E)  == embedding(x.T)
    x = jnp.transpose(x, (0, 2, 1))             # (S, E, B)
    feats = []
    for k, (w, b) in zip(kernel_sizes, conv_params):   # w: (F, E, k)
        l_out = B - k + 1
        cols = []
        for p in range(l_out):
            win = x[:, :, p:p + k]                          # (S, E, k)
            cols.append(jnp.einsum('sek,fek->sf', win, w) + b)
        c = jnp.maximum(jnp.stack(cols, axis=-1), 0.0)      # (S, F, L_out)
        feats.append(jnp.max(c, axis=-1))                   # (S, F)
    feat = jnp.concatenate(feats, axis=1)                   # (S, n*F)
    return feat @ wfc.T + bfc                               # (S, C)


# ----------------------------- driver -----------------------------

if __name__ == "__main__":
    vocab_size = 50
    embedding_dim = 32
    kernel_sizes = (2, 3, 4)
    num_filters = 16
    num_classes = 8
    batch_size = 8        # conv "length" axis in this module's forward
    seq_len = 16

    key = jax.random.PRNGKey(0)
    keys = jax.random.split(key, 4 + 2 * len(kernel_sizes))

    # nn.Embedding init: N(0,1), padding_idx=0 row zeroed.
    emb_table = jax.random.normal(keys[0], (vocab_size, embedding_dim),
                                  jnp.float32).at[0].set(0.0)

    # nn.Conv1d default init: U(-1/sqrt(E*k), 1/sqrt(E*k)); torch layout (F, E, k).
    conv_params = []
    for i, k in enumerate(kernel_sizes):
        bound = 1.0 / math.sqrt(embedding_dim * k)
        w = jax.random.uniform(keys[1 + 2 * i], (num_filters, embedding_dim, k),
                               jnp.float32, -bound, bound)
        b = jax.random.uniform(keys[2 + 2 * i], (num_filters,),
                               jnp.float32, -bound, bound)
        conv_params.append((w, b))

    fan_in = len(kernel_sizes) * num_filters
    bound = 1.0 / math.sqrt(fan_in)
    wfc = jax.random.uniform(keys[-2], (num_classes, fan_in),
                             jnp.float32, -bound, bound)
    bfc = jax.random.uniform(keys[-1], (num_classes,),
                             jnp.float32, -bound, bound)

    tokens = jax.random.randint(keys[3], (batch_size, seq_len), 0, vocab_size,
                                dtype=jnp.int32)

    out = textcnn_forward_pallas(tokens, emb_table, conv_params, wfc, bfc,
                                 kernel_sizes)
    out = jax.block_until_ready(out)

    ref = textcnn_forward_ref(tokens, emb_table, conv_params, wfc, bfc,
                              kernel_sizes)
    assert out.shape == (seq_len, num_classes), out.shape
    # bf16 MXU operands (f32 accumulation) vs. f32 reference -> loosened tolerance.
    max_err = float(jnp.max(jnp.abs(out - ref)))
    assert jnp.allclose(out, ref, rtol=5e-2, atol=5e-2), max_err

    print("KERNEL_OK")
</pallas_src>

<mosaic_0001>
module attributes {stable_mosaic.version = 11 : i64} {
  func.func @_textcnn_kernel(%arg0: i32, %arg1: memref<8x16x32xbf16, #tpu.memory_space<vmem>>, %arg2: memref<96x256xbf16, #tpu.memory_space<vmem>>, %arg3: memref<3x128xf32, #tpu.memory_space<vmem>>, %arg4: memref<16x128xf32, #tpu.memory_space<vmem>>) attributes {dimension_semantics = [#tpu.dimension_semantics<parallel>], iteration_bounds = array<i64: 1>, scalar_prefetch = 0 : i64, scratch_operands = 0 : i64, tpu.core_type = #tpu.core_type<tc>, window_params = [{transform_indices = @transform_0, window_bounds = array<i64: 8, 16, 32>}, {pipeline_mode = #tpu.pipeline_mode<synchronous>, transform_indices = @transform_1, window_bounds = array<i64: 96, 256>}, {pipeline_mode = #tpu.pipeline_mode<synchronous>, transform_indices = @transform_2, window_bounds = array<i64: 3, 128>}, {transform_indices = @transform_3, window_bounds = array<i64: 16, 128>}]} {
    %c0 = arith.constant 0 : index
    %c0_0 = arith.constant 0 : index
    %c0_1 = arith.constant 0 : index
    %0 = vector.load %arg1[%c0, %c0_0, %c0_1] : memref<8x16x32xbf16, #tpu.memory_space<vmem>>, vector<8x16x32xbf16>
    %1 = vector.shape_cast %0 : vector<8x16x32xbf16> to vector<128x32xbf16>
    %c0_2 = arith.constant 0 : index
    %c0_3 = arith.constant 0 : index
    %2 = vector.load %arg2[%c0_2, %c0_3] : memref<96x256xbf16, #tpu.memory_space<vmem>>, vector<32x256xbf16>
    %cst = arith.constant dense<0.000000e+00> : vector<128x256xf32>
    %3 = tpu.matmul %1, %2, %cst {dimension_numbers = #tpu.dot_dimension_numbers<[1], [0], [0], [1], [0, 0, 1, 1], [], []>} : vector<128x32xbf16>, vector<32x256xbf16>, vector<128x256xf32> -> vector<128x256xf32>
    %4 = vector.extract_strided_slice %3 {offsets = [0, 0], sizes = [128, 64], strides = [1, 1]} : vector<128x256xf32> to vector<128x64xf32>
    %5 = vector.extract_strided_slice %3 {offsets = [0, 64], sizes = [128, 64], strides = [1, 1]} : vector<128x256xf32> to vector<128x64xf32>
    %c112_i32 = arith.constant 112 : i32
    %6 = tpu.dynamic_rotate %5 by %c112_i32 dim 0 : vector<128x64xf32>, i32 -> vector<128x64xf32>
    %7 = arith.addf %4, %6 : vector<128x64xf32>
    %8 = vector.extract_strided_slice %3 {offsets = [0, 128], sizes = [128, 64], strides = [1, 1]} : vector<128x256xf32> to vector<128x64xf32>
    %c96_i32 = arith.constant 96 : i32
    %9 = tpu.dynamic_rotate %8 by %c96_i32 dim 0 : vector<128x64xf32>, i32 -> vector<128x64xf32>
    %10 = arith.addf %7, %9 : vector<128x64xf32>
    %11 = vector.extract_strided_slice %3 {offsets = [0, 192], sizes = [128, 64], strides = [1, 1]} : vector<128x256xf32> to vector<128x64xf32>
    %c80_i32 = arith.constant 80 : i32
    %12 = tpu.dynamic_rotate %11 by %c80_i32 dim 0 : vector<128x64xf32>, i32 -> vector<128x64xf32>
    %13 = arith.addf %10, %12 : vector<128x64xf32>
    %c1 = arith.constant 1 : index
    %c0_4 = arith.constant 0 : index
    %14 = vector.load %arg3[%c1, %c0_4] : memref<3x128xf32, #tpu.memory_space<vmem>>, vector<1x64xf32>
    %15 = vector.extract_strided_slice %13 {offsets = [0, 0], sizes = [16, 64], strides = [1, 1]} : vector<128x64xf32> to vector<16x64xf32>
    %16 = vector.extract_strided_slice %13 {offsets = [16, 0], sizes = [16, 64], strides = [1, 1]} : vector<128x64xf32> to vector<16x64xf32>
    %17 = vector.extract_strided_slice %13 {offsets = [32, 0], sizes = [16, 64], strides = [1, 1]} : vector<128x64xf32> to vector<16x64xf32>
    %18 = vector.extract_strided_slice %13 {offsets = [48, 0], sizes = [16, 64], strides = [1, 1]} : vector<128x64xf32> to vector<16x64xf32>
    %19 = vector.extract_strided_slice %13 {offsets = [64, 0], sizes = [16, 64], strides = [1, 1]} : vector<128x64xf32> to vector<16x64xf32>
    %20 = vector.extract_strided_slice %13 {offsets = [80, 0], sizes = [16, 64], strides = [1, 1]} : vector<128x64xf32> to vector<16x64xf32>
    %cst_5 = arith.constant 5.000000e+00 : f32
    %21 = vector.broadcast %cst_5 : f32 to vector<1x64xf32>
    %22 = arith.cmpf oge, %14, %21 : vector<1x64xf32>
    %cst_6 = arith.constant -1.000000e+30 : f32
    %23 = vector.shape_cast %22 : vector<1x64xi1> to vector<1x64xi1>
    %24 = vector.broadcast %23 : vector<1x64xi1> to vector<16x64xi1>
    %25 = vector.broadcast %cst_6 : f32 to vector<16x64xf32>
    %26 = arith.select %24, %20, %25 : vector<16x64xi1>, vector<16x64xf32>
    %27 = vector.extract_strided_slice %13 {offsets = [96, 0], sizes = [16, 64], strides = [1, 1]} : vector<128x64xf32> to vector<16x64xf32>
    %cst_7 = arith.constant 6.000000e+00 : f32
    %28 = vector.broadcast %cst_7 : f32 to vector<1x64xf32>
    %29 = arith.cmpf oge, %14, %28 : vector<1x64xf32>
    %cst_8 = arith.constant -1.000000e+30 : f32
    %30 = vector.shape_cast %29 : vector<1x64xi1> to vector<1x64xi1>
    %31 = vector.broadcast %30 : vector<1x64xi1> to vector<16x64xi1>
    %32 = vector.broadcast %cst_8 : f32 to vector<16x64xf32>
    %33 = arith.select %31, %27, %32 : vector<16x64xi1>, vector<16x64xf32>
    %34 = vector.extract_strided_slice %13 {offsets = [112, 0], sizes = [16, 64], strides = [1, 1]} : vector<128x64xf32> to vector<16x64xf32>
    %cst_9 = arith.constant 7.000000e+00 : f32
    %35 = vector.broadcast %cst_9 : f32 to vector<1x64xf32>
    %36 = arith.cmpf oge, %14, %35 : vector<1x64xf32>
    %cst_10 = arith.constant -1.000000e+30 : f32
    %37 = vector.shape_cast %36 : vector<1x64xi1> to vector<1x64xi1>
    %38 = vector.broadcast %37 : vector<1x64xi1> to vector<16x64xi1>
    %39 = vector.broadcast %cst_10 : f32 to vector<16x64xf32>
    %40 = arith.select %38, %34, %39 : vector<16x64xi1>, vector<16x64xf32>
    %41 = arith.maximumf %15, %16 : vector<16x64xf32>
    %42 = arith.maximumf %17, %18 : vector<16x64xf32>
    %43 = arith.maximumf %19, %26 : vector<16x64xf32>
    %44 = arith.maximumf %33, %40 : vector<16x64xf32>
    %45 = arith.maximumf %41, %42 : vector<16x64xf32>
    %46 = arith.maximumf %43, %44 : vector<16x64xf32>
    %47 = arith.maximumf %45, %46 : vector<16x64xf32>
    %c0_11 = arith.constant 0 : index
    %c0_12 = arith.constant 0 : index
    %48 = vector.load %arg3[%c0_11, %c0_12] : memref<3x128xf32, #tpu.memory_space<vmem>>, vector<1x64xf32>
    %49 = vector.broadcast %48 : vector<1x64xf32> to vector<16x64xf32>
    %50 = arith.addf %47, %49 : vector<16x64xf32>
    %cst_13 = arith.constant 0.000000e+00 : f32
    %51 = vector.broadcast %cst_13 : f32 to vector<16x64xf32>
    %52 = arith.maximumf %50, %51 : vector<16x64xf32>
    %53 = arith.truncf %52 : vector<16x64xf32> to vector<16x64xbf16>
    %c32 = arith.constant 32 : index
    %c0_14 = arith.constant 0 : index
    %54 = vector.load %arg2[%c32, %c0_14] : memref<96x256xbf16, #tpu.memory_space<vmem>>, vector<64x128xbf16>
    %cst_15 = arith.constant dense<0.000000e+00> : vector<16x128xf32>
    %55 = tpu.matmul %53, %54, %cst_15 {dimension_numbers = #tpu.dot_dimension_numbers<[1], [0], [0], [1], [0, 0, 1, 1], [], []>} : vector<16x64xbf16>, vector<64x128xbf16>, vector<16x128xf32> -> vector<16x128xf32>
    %c2 = arith.constant 2 : index
    %c0_16 = arith.constant 0 : index
    %56 = vector.load %arg3[%c2, %c0_16] : memref<3x128xf32, #tpu.memory_space<vmem>>, vector<1x128xf32>
    %57 = vector.broadcast %56 : vector<1x128xf32> to vector<16x128xf32>
    %58 = arith.addf %55, %57 : vector<16x128xf32>
    %c0_17 = arith.constant 0 : index
    %c0_18 = arith.constant 0 : index
    %59 = vector.load %arg4[%c0_17, %c0_18] : memref<16x128xf32, #tpu.memory_space<vmem>>, vector<16x128xf32>
    tpu.vector_store %arg4[%c0_17, %c0_18], %58 {strides = array<i32>} : memref<16x128xf32, #tpu.memory_space<vmem>>, vector<16x128xf32>,
    return
  }
  func.func @transform_0(%arg0: i32) -> (i32, i32, i32) {
    %c0_i32 = arith.constant 0 : i32
    %c0_i32_0 = arith.constant 0 : i32
    %c0_i32_1 = arith.constant 0 : i32
    return %c0_i32, %arg0, %c0_i32_0 : i32, i32, i32
  }
  func.func @transform_1(%arg0: i32) -> (i32, i32) {
    %c0_i32 = arith.constant 0 : i32
    %c0_i32_0 = arith.constant 0 : i32
    %c0_i32_1 = arith.constant 0 : i32
    return %c0_i32, %c0_i32_0 : i32, i32
  }
  func.func @transform_2(%arg0: i32) -> (i32, i32) {
    %c0_i32 = arith.constant 0 : i32
    %c0_i32_0 = arith.constant 0 : i32
    %c0_i32_1 = arith.constant 0 : i32
    return %c0_i32, %c0_i32_0 : i32, i32
  }
  func.func @transform_3(%arg0: i32) -> (i32, i32) {
    %c0_i32 = arith.constant 0 : i32
    %c0_i32_0 = arith.constant 0 : i32
    return %arg0, %c0_i32 : i32, i32
  }
}

</mosaic_0001>

<bundles_post_ra>
// kernel: tpu_custom_call.1
= control target key start
LH: loop header
LB: loop body
LE: loop exit
PB: predicated region body
PF: predicated region fallthrough
CT: control target
= control target key end

     0   :  { %8 = vsyncpa [#allocation3], 0  ;;  %s1025_s0 = inlined_call_operand.hbm [shape: bf16[8,16,32], index: 0, kind: input, shape index: {}]   ;;  %s1026_s1 = inlined_call_operand.hbm [shape: bf16[96,256], index: 1, kind: input, shape index: {}]   ;;  %s1027_s2 = inlined_call_operand.vmem [shape: f32[3,128], index: 2, kind: input, shape index: {}]   ;;  %s1028_s3 = inlined_call_operand.hbm [shape: f32[16,128], index: 3, kind: output, shape index: {}]  }
   0x1   :  { %9 = vsyncpa [#allocation6], 0 }
   0x2   :  { %10 = vsyncpa [#allocation4], 0  ;;  %s740_s12 = smov [#allocation2]   ;;  %s668_s16 = scalar_lea.hbm %s1025_s0, 1024 }
   0x3   :  { %s16_s13 = sshll.u32 %s740_s12, 4  ;;  %p669_p0 = scmp.ne.s32.totalorder %s1025_s0, %s668_s16  ;;  %s17_s13 = int_to_ptr.vmem [resolvable:$true] %s16_s13 }
   0x4   :  { %p672_p1 = scmp.lt.u32.totalorder %s668_s16, %s1025_s0 }
   0x6   :  { %p674_p2 = pnand %p672_p1, %p669_p0 }
   0x8   :  { %677 = shalt.err (!%p674_p2)
}
   0x9   :  { %s678_s21 = scalar_lea.vmem %s17_s13, 1024  ;;  %p683_p4 = scmp.lt.s32.totalorder %s17_s13, %s17_s13 }
   0xa   :  { %p679_p3 = scmp.ne.s32.totalorder %s17_s13, %s678_s21  ;;  %p684_p5 = scmp.lt.s32.totalorder %s678_s21, %s678_s21 }
   0xc   :  { %p685_p6 = por %p684_p5, %p683_p4 }
   0xe   :  { %p686_p7 = pnand %p685_p6, %p679_p3 }
  0x10   :  { %689 = shalt.err (!%p686_p7)
}
  0x11   :  { %s741_s22 = smov 64   ;;  %s742_s23 = smov 4  }
  0x12   :  { %22 = dma.hbm_to_vmem [thread:$0]  %s1025_s0, 1024, %s17_s13, [#allocation3], %s741_s22, %s741_s22, %s742_s23  }
  0x13   :  { %s743_s26 = smov [#allocation5]   ;;  %s690_s30 = scalar_lea.hbm %s1026_s1, 1536 }
  0x14   :  { %s28_s27 = sshll.u32 %s743_s26, 4  ;;  %p691_p8 = scmp.ne.s32.totalorder %s1026_s1, %s690_s30  ;;  %s29_s27 = int_to_ptr.vmem [resolvable:$true] %s28_s27 }
  0x15   :  { %p694_p9 = scmp.lt.u32.totalorder %s690_s30, %s1026_s1 }
  0x17   :  { %p696_p10 = pnand %p694_p9, %p691_p8 }
  0x19   :  { %699 = shalt.err (!%p696_p10)
}
  0x1a   :  { %s700_s8 = scalar_lea.vmem %s29_s27, 1536  ;;  %p705_p12 = scmp.lt.s32.totalorder %s29_s27, %s29_s27 }
  0x1b   :  { %p701_p11 = scmp.ne.s32.totalorder %s29_s27, %s700_s8  ;;  %p706_p13 = scmp.lt.s32.totalorder %s700_s8, %s700_s8 }
  0x1d   :  { %p707_p0 = por %p706_p13, %p705_p12 }
  0x1f   :  { %p708_p1 = pnand %p707_p0, %p701_p11 }
  0x21   :  { %711 = shalt.err (!%p708_p1)
}
  0x22   :  { %s744_s0 = smov 128   ;;  %s745_s9 = smov 8  }
  0x23   :  { %34 = dma.hbm_to_vmem [thread:$0]  %s1026_s1, 1536, %s29_s27, [#allocation6], %s744_s0, %s744_s0, %s745_s9  }
  0x24   :  { %734 = dma.done.wait [#allocation3], 1024  }
  0x25   :  { %735 = vsyncadd [#allocation3], 4294966272 }
  0x26   :  { %736 = dma.done.wait [#allocation6], 1536  }
  0x27   :  { %737 = vsyncadd [#allocation6], 4294965760  ;;  %v746_v0 = vmov 0   ;;  %v650_v1 = vld [vmem:[#allocation5 + $0x4] ss:$8 sps:$4 sm:$0xff]   ;;  %vm124_vm0 = vcmask 261120  }
  0x28   :  { %181 = vmatprep.mubr.bf16.mxu0 %v746_v0  ;;  %231 = vmatprep.mubr.bf16.mxu1 %v746_v0  ;;  %v652_v2 = vld [vmem:[#allocation5] ss:$8 sps:$4 sm:$0xff]   ;;  %v653_v3 = vld [vmem:[#allocation5 + $0x14] ss:$8 sps:$4 sm:$0xff]   ;;  %v655_v4 = vld [vmem:[#allocation5 + $0x10] ss:$8 sps:$4 sm:$0xff]  }
  0x29   :  { %149 = vmatprep.subr.bf16.mxu0 %v650_v1  ;;  %636 = vmatprep.subr.bf16.mxu1 %v650_v1  ;;  %v656_v5 = vld [vmem:[#allocation2] sm:$0xff]   ;;  %v657_v6 = vld [vmem:[#allocation2 + $0x28] sm:$0xff]   ;;  %v658_v7 = vld [vmem:[#allocation2 + $0x30] sm:$0xff]   ;;  %v747_v45 = vmov 0.0   ;;  %vm748_vm1 = vmmov 0   ;;  %vm527_vm8 = vcmask 523264  }
  0x2a   :  { %150 = vmatpush1.bf16.msra.mxu0 %v652_v2  ;;  %638 = vmatpush1.bf16.msra.mxu1 %v652_v2  ;;  %v659_v8 = vld [vmem:[#allocation2 + $0x8] sm:$0xff]   ;;  %v660_v9 = vld [vmem:[#allocation2 + $0x38] sm:$0xff]   ;;  %v661_v10 = vld [vmem:[#allocation2 + $0x10] sm:$0xff]   ;;  %s749_s17 = smov [#allocation7]  }
  0x2b   :  { %151 = vmatprep.subr.bf16.mxu0 %v653_v3  ;;  %637 = vmatprep.subr.bf16.mxu1 %v653_v3  ;;  %v662_v11 = vld [vmem:[#allocation2 + $0x18] sm:$0xff]   ;;  %v663_v12 = vld [vmem:[#allocation2 + $0x20] sm:$0xff]   ;;  %s579_s18 = sshll.u32 %s749_s17, 4  ;;  %s580_s18 = int_to_ptr.vmem [resolvable:$true] %s579_s18 }
  0x2c   :  { %v664_v46 = vld [vmem:[#allocation5 + $0x20] ss:$8 sps:$4 sm:$0xff]   ;;  %v665_v47 = vld [vmem:[#allocation5 + $0x30] ss:$8 sps:$4 sm:$0xff]   ;;  %s712_s19 = scalar_lea.vmem %s580_s18, 256  ;;  %p717_p3 = scmp.lt.s32.totalorder %s580_s18, %s580_s18 }
  0x2d   :  { %v666_v48 = vld [vmem:[#allocation5 + $0x40] ss:$8 sps:$4 sm:$0xff]   ;;  %v667_v49 = vld [vmem:[#allocation5 + $0x50] ss:$8 sps:$4 sm:$0xff]   ;;  %p713_p2 = scmp.ne.s32.totalorder %s580_s18, %s712_s19  ;;  %p718_p4 = scmp.lt.s32.totalorder %s712_s19, %s712_s19 }
  0x2e   :  { %152 = vmatpush1.bf16.msra.mxu0 %v655_v4  ;;  %639 = vmatpush1.bf16.msra.mxu1 %v655_v4 }
  0x2f   :  { %624 = vmatprep.subr.bf16.mxu1 %v747_v45  ;;  %p719_p5 = por %p718_p4, %p717_p3 }
  0x31   :  { %604 = vmatmul.mubr.msk.bf16.vlgmr.msra.gmra.mrb[0].mxu0 %vm124_vm0, %v656_v5  ;;  %609 = vmatmul.mubr.msk.bf16.vlgmr.msra.gmra.mrb[0].mxu1 %vm124_vm0, %v657_v6  ;;  %p720_p6 = pnand %p719_p5, %p713_p2 }
  0x32   :  { %241 = vmatprep.mubr.bf16.mxu1 %v746_v0  ;;  %191 = vmatprep.mubr.bf16.mxu0 %v746_v0 }
  0x33   :  { %625 = vmatpush3.bf16.msra.mxu1 %v664_v46 }
  0x34   :  { %626 = vmatprep.subr.bf16.mxu1 %v747_v45 }
  0x37   :  { %627 = vmatpush3.bf16.msra.mxu1 %v665_v47 }
  0x38   :  { %628 = vmatprep.subr.bf16.mxu1 %v747_v45 }
  0x39   :  { %610 = vmatmul.mubr.msk.bf16.gmra.mrb[4].mxu1 %vm124_vm0, %v658_v7  ;;  %605 = vmatmul.mubr.msk.bf16.gmra.mrb[4].mxu0 %vm124_vm0, %v659_v8 }
  0x3a   :  { %251 = vmatprep.mubr.bf16.mxu1 %v746_v0  ;;  %201 = vmatprep.mubr.bf16.mxu0 %v746_v0 }
  0x3b   :  { %629 = vmatpush3.bf16.msra.mxu1 %v666_v48 }
  0x3c   :  { %630 = vmatprep.subr.bf16.mxu1 %v747_v45 }
  0x3f   :  { %631 = vmatpush3.bf16.msra.mxu1 %v667_v49 }
  0x41   :  { %611 = vmatmul.mubr.msk.bf16.gmra.mrb[8].mxu1 %vm124_vm0, %v660_v9  ;;  %606 = vmatmul.mubr.msk.bf16.gmra.mrb[8].mxu0 %vm124_vm0, %v661_v10 }
  0x42   :  { %211 = vmatprep.mubr.bf16.mxu0 %v746_v0  ;;  %632 = vmatprep.mubr.msk.bf16.mxu1 %vm748_vm1, %v747_v45 }
  0x49   :  { %607 = vmatmul.mubr.msk.bf16.gmra.mrb[12].mxu0 %vm124_vm0, %v662_v11 }
  0x4a   :  { %221 = vmatprep.mubr.bf16.mxu0 %v746_v0 }
  0x51   :  { %608 = vmatmul.mubr.msk.bf16.gmra.mrb[16].mxu0 %vm124_vm0, %v663_v12 }
 0x104   :  { %v815_v13 = vpop.f32.mrb[0].mxu0  ;;  %v817_v14 = vpop.f32.mrb[0].mxu1 }
 0x105   :  { %v819_v15 = vpop.f32.mrb[1].mxu1  ;;  %278 = vrot.lane.b32.xlu0 %v815_v13, %s741_s22  ;;  %v823_v16 = vpop.f32.mrb[1].mxu0 }
 0x106   :  { %v825_v17 = vpop.f32.mrb[2].mxu0  ;;  %v827_v18 = vpop.f32.mrb[2].mxu1 }
 0x107   :  { %300 = vrot.lane.b32.xlu1 %v827_v18, %s741_s22  ;;  %v831_v19 = vpop.f32.mrb[3].mxu0  ;;  %v833_v20 = vpop.f32.mrb[3].mxu1 }
 0x109   :  { %298 = vrot.lane.b32.xlu0 %v817_v14, %s741_s22 }
 0x10b   :  { %376 = vrot.lane.b32.xlu1 %v831_v19, %s741_s22 }
 0x10c   :  { %v839_v21 = vpop.f32.mrb[4].mxu1  ;;  %v841_v22 = vpop.f32.mrb[4].mxu0 }
 0x10d   :  { %374 = vrot.lane.b32.xlu0 %v823_v16, %s741_s22  ;;  %v845_v23 = vpop.f32.mrb[5].mxu1  ;;  %v847_v24 = vpop.f32.mrb[5].mxu0 }
 0x10e   :  { %v849_v25 = vpop.f32.mrb[6].mxu1  ;;  %v851_v26 = vpop.f32.mrb[6].mxu0 }
 0x10f   :  { %396 = vrot.lane.b32.xlu1 %v833_v20, %s741_s22  ;;  %v855_v27 = vpop.f32.mrb[7].mxu1  ;;  %v857_v28 = vpop.f32.mrb[7].mxu0 }
 0x111   :  { %394 = vrot.lane.b32.xlu0 %v819_v15, %s741_s22 }
 0x113   :  { %302 = vrot.lane.b32.xlu1 %v839_v21, %s741_s22 }
 0x114   :  { %v253_v29 = vpop.f32.mrb[8].mxu1  ;;  %v863_v30 = vpop.f32.mrb[8].mxu0 }
 0x115   :  { %280 = vrot.lane.b32.xlu0 %v825_v17, %s741_s22  ;;  %v867_v31 = vpop.f32.mrb[9].mxu1  ;;  %v869_v32 = vpop.f32.mrb[9].mxu0 }
 0x116   :  { %v871_v33 = vpop.f32.mrb[10].mxu1  ;;  %v873_v34 = vpop.f32.mrb[10].mxu0 }
 0x117   :  { %304 = vrot.lane.b32.xlu1 %v849_v25, %s741_s22  ;;  %v877_v35 = vpop.f32.mrb[11].mxu1  ;;  %v879_v36 = vpop.f32.mrb[11].mxu0 }
 0x119   :  { %282 = vrot.lane.b32.xlu0 %v841_v22, %s741_s22 }
 0x11b   :  { %284 = vrot.lane.b32.xlu1 %v851_v26, %s741_s22 }
 0x11c   :  { %v885_v37 = vpop.f32.mrb[12].mxu0 }
 0x11d   :  { %378 = vrot.lane.b32.xlu0 %v847_v24, %s741_s22  ;;  %v889_v38 = vpop.f32.mrb[13].mxu0 }
 0x11e   :  { %v891_v39 = vpop.f32.mrb[14].mxu0 }
 0x11f   :  { %380 = vrot.lane.b32.xlu1 %v857_v28, %s741_s22  ;;  %v895_v40 = vpop.f32.mrb[15].mxu0 }
 0x121   :  { %398 = vrot.lane.b32.xlu0 %v845_v23, %s741_s22 }
 0x123   :  { %400 = vrot.lane.b32.xlu1 %v855_v27, %s741_s22 }
 0x124   :  { %v223_v41 = vpop.f32.mrb[16].mxu0 }
 0x125   :  { %306 = vrot.lane.b32.xlu0 %v253_v29, %s741_s22  ;;  %v902_v42 = vpop.f32.mrb[17].mxu0 }
 0x126   :  { %v227_v43 = vpop.f32.mrb[18].mxu0 }
 0x127   :  { %308 = vrot.lane.b32.xlu1 %v871_v33, %s741_s22  ;;  %v906_v44 = vpop.f32.mrb[19].mxu0 }
 0x129   :  { %286 = vrot.lane.b32.xlu0 %v863_v30, %s741_s22 }
 0x12b   :  { %288 = vrot.lane.b32.xlu1 %v873_v34, %s741_s22 }
 0x12d   :  { %382 = vrot.lane.b32.xlu0 %v869_v32, %s741_s22 }
 0x12f   :  { %384 = vrot.lane.b32.xlu1 %v879_v36, %s741_s22 }
 0x131   :  { %290 = vrot.lane.b32.xlu0 %v885_v37, %s741_s22 }
 0x133   :  { %292 = vrot.lane.b32.xlu1 %v891_v39, %s741_s22 }
 0x135   :  { %386 = vrot.lane.b32.xlu0 %v889_v38, %s741_s22 }
 0x137   :  { %388 = vrot.lane.b32.xlu1 %v895_v40, %s741_s22 }
 0x139   :  { %294 = vrot.lane.b32.xlu0 %v223_v41, %s741_s22 }
 0x13b   :  { %296 = vrot.lane.b32.xlu1 %v227_v43, %s741_s22 }
 0x13d   :  { %390 = vrot.lane.b32.xlu0 %v902_v42, %s741_s22 }
 0x13f   :  { %392 = vrot.lane.b32.xlu1 %v906_v44, %s741_s22 }
 0x141   :  { %402 = vrot.lane.b32.xlu0 %v867_v31, %s741_s22 }
 0x143   :  { %404 = vrot.lane.b32.xlu1 %v877_v35, %s741_s22 }
 0x177   :  { %v279_v50 = vpop.permute.xlu0 %278 }
 0x178   :  { %v340_v51 = vadd.f32 %v279_v50, %v253_v29  ;;  %v441_v29 = vlaneseq }
 0x179   :  { %v301_v52 = vpop.permute.xlu1 %300 }
 0x17a   :  { %v335_v53 = vadd.f32 %v301_v52, %v227_v43  ;;  %v356_v54 = vadd.f32 %v340_v51, %v847_v24 }
 0x17b   :  { %v299_v55 = vpop.permute.xlu0 %298 }
 0x17c   :  { %v334_v56 = vadd.f32 %v299_v55, %v223_v41  ;;  %v936_v57 = vadd.f32 %v335_v53, %v855_v27 }
 0x17d   :  { %v938_v58 = vpop.permute.xlu1 %376 }
 0x17e   :  { %v941_v59 = vadd.f32 %v334_v56, %v845_v23 }
 0x17f   :  { %v943_v60 = vpop.permute.xlu0 %374 }
 0x181   :  { %v945_v61 = vpop.permute.xlu1 %396 }
 0x183   :  { %v947_v62 = vpop.permute.xlu0 %394 }
 0x185   :  { %v303_v63 = vpop.permute.xlu1 %302 }
 0x186   :  { %v336_v1 = vadd.f32 %v303_v63, %v817_v14 }
 0x187   :  { %v281_v2 = vpop.permute.xlu0 %280 }
 0x188   :  { %v951_v3 = vadd.f32 %v336_v1, %v867_v31  ;;  %v341_v4 = vadd.f32 %v281_v2, %v871_v33  ;;  %v442_v33 = vshrl.u32 %v441_v29, 7 }
 0x189   :  { %v305_v5 = vpop.permute.xlu1 %304 }
 0x18a   :  { %v337_v6 = vadd.f32 %v305_v5, %v827_v18  ;;  %v357_v7 = vadd.f32 %v341_v4, %v857_v28  ;;  %v438_v28 = vld [vmem:[%s1027_s2 + $0x1] sm:$0x1]  ;;  %v443_v41 = vsub.s32 0, %v442_v33 }
 0x18b   :  { %v283_v8 = vpop.permute.xlu0 %282  ;;  %vm448_vm2 = vcmp.ge.f32.partialorder %v438_v28, 6.0  ;;  %vm457_vm3 = vcmp.ge.f32.partialorder %v438_v28, 7.0  ;;  %vm439_vm6 = vcmp.ge.f32.partialorder %v438_v28, 5.0 }
 0x18c   :  { %v957_v9 = vadd.f32 %v337_v6, %v877_v35  ;;  %v326_v10 = vadd.f32 %v283_v8, %v815_v13  ;;  %v458_v35 = vsel %vm457_vm3, 1, %v746_v0 }
 0x18d   :  { %v285_v11 = vpop.permute.xlu1 %284  ;;  %v462_v48 = vrot.slane %v458_v35, %v443_v41 }
 0x18e   :  { %v327_v12 = vadd.f32 %v285_v11, %v825_v17  ;;  %v342_v14 = vadd.f32 %v326_v10, %v869_v32  ;;  %v449_v32 = vsel %vm448_vm2, 1, %v746_v0 }
 0x18f   :  { %v379_v23 = vpop.permute.xlu0 %378  ;;  %v453_v47 = vrot.slane %v449_v32, %v443_v41  ;;  %vm463_vm5 = vcmp.eq.s32.totalorder %v462_v48, 1 }
 0x190   :  { %v963_v24 = vadd.f32 %v327_v12, %v879_v36 }
 0x191   :  { %v381_v27 = vpop.permute.xlu1 %380  ;;  %vm454_vm4 = vcmp.eq.s32.totalorder %v453_v47, 1 }
 0x193   :  { %v399_v18 = vpop.permute.xlu0 %398 }
 0x195   :  { %v401_v31 = vpop.permute.xlu1 %400 }
 0x197   :  { %v307_v13 = vpop.permute.xlu0 %306 }
 0x198   :  { %v338_v17 = vadd.f32 %v307_v13, %v839_v21 }
 0x199   :  { %v309_v36 = vpop.permute.xlu1 %308 }
 0x19a   :  { %v354_v43 = vadd.f32 %v338_v17, %v823_v16  ;;  %v339_v45 = vadd.f32 %v309_v36, %v849_v25 }
 0x19b   :  { %v287_v46 = vpop.permute.xlu0 %286 }
 0x19c   :  { %v355_v49 = vadd.f32 %v339_v45, %v831_v19  ;;  %v328_v50 = vadd.f32 %v287_v46, %v841_v22  ;;  %v434_v52 = vadd.f32 %v379_v23, %v354_v43  ;;  %v440_v23 = vsel %vm439_vm6, 1, %v746_v0 }
 0x19d   :  { %v289_v51 = vpop.permute.xlu1 %288  ;;  %v444_v33 = vrot.slane %v440_v23, %v443_v41  ;;  %v432_v0 = vadd.f32 %v943_v60, %v951_v3 }
 0x19e   :  { %v329_v21 = vadd.f32 %v289_v51, %v851_v26  ;;  %v344_v53 = vadd.f32 %v328_v50, %v889_v38  ;;  %v435_v56 = vadd.f32 %v381_v27, %v355_v49  ;;  %v455_v1 = vsel %vm454_vm4, %v434_v52, -1e+30 }
 0x19f   :  { %v383_v55 = vpop.permute.xlu0 %382  ;;  %vm992_vm7 = vcmp.eq.s32.totalorder %v444_v33, 1 }
 0x1a0   :  { %v436_v16 = vadd.f32 %v383_v55, %v356_v54  ;;  %v345_v25 = vadd.f32 %v329_v21, %v895_v40  ;;  %v456_v22 = vsel %vm454_vm4, %v435_v56, -1e+30  ;;  %v446_v3 = vsel %vm992_vm7, %v432_v0, -1e+30 }
 0x1a1   :  { %v385_v63 = vpop.permute.xlu1 %384 }
 0x1a2   :  { %v464_v2 = vsel %vm463_vm5, %v436_v16, -1e+30  ;;  %v437_v4 = vadd.f32 %v385_v63, %v357_v7 }
 0x1a3   :  { %v472_v19 = vmax.f32 %v455_v1, %v464_v2  ;;  %v291_v5 = vpop.permute.xlu0 %290 }
 0x1a4   :  { %v465_v6 = vsel %vm463_vm5, %v437_v4, -1e+30  ;;  %v330_v8 = vadd.f32 %v291_v5, %v863_v30 }
 0x1a5   :  { %v473_v26 = vmax.f32 %v456_v22, %v465_v6  ;;  %v293_v10 = vpop.permute.xlu1 %292 }
 0x1a6   :  { %v346_v38 = vadd.f32 %v330_v8, %v902_v42  ;;  %v331_v11 = vadd.f32 %v293_v10, %v873_v34 }
 0x1a7   :  { %v387_v12 = vpop.permute.xlu0 %386 }
 0x1a8   :  { %v347_v40 = vadd.f32 %v331_v11, %v906_v44  ;;  %v426_v42 = vadd.f32 %v947_v62, %v346_v38  ;;  %v422_v34 = vadd.f32 %v387_v12, %v342_v14 }
 0x1a9   :  { %v389_v54 = vpop.permute.xlu1 %388 }
 0x1aa   :  { %v427_v35 = vadd.f32 %v945_v61, %v347_v40 }
 0x1ab   :  { %v295_v7 = vpop.permute.xlu0 %294 }
 0x1ac   :  { %v332_v27 = vadd.f32 %v295_v7, %v885_v37  ;;  %v423_v37 = vadd.f32 %v389_v54, %v963_v24 }
 0x1ad   :  { %v297_v29 = vpop.permute.xlu1 %296 }
 0x1ae   :  { %v348_v30 = vadd.f32 %v332_v27, %v819_v15  ;;  %v333_v13 = vadd.f32 %v297_v29, %v891_v39 }
 0x1af   :  { %v391_v17 = vpop.permute.xlu0 %390 }
 0x1b0   :  { %v428_v32 = vadd.f32 %v399_v18, %v348_v30  ;;  %v349_v28 = vadd.f32 %v333_v13, %v833_v20  ;;  %v424_v44 = vadd.f32 %v391_v17, %v344_v53  ;;  %v433_v20 = vadd.f32 %v938_v58, %v957_v9  ;;  %v612_v58 = vld [vmem:[%s1027_s2] ss:$0 sm:$0xff] }
 0x1b1   :  { %v393_v36 = vpop.permute.xlu1 %392 }
 0x1b2   :  { %v429_v39 = vadd.f32 %v401_v31, %v349_v28  ;;  %v466_v62 = vmax.f32 %v422_v34, %v424_v44  ;;  %v468_v41 = vmax.f32 %v426_v42, %v428_v32  ;;  %v425_v14 = vadd.f32 %v393_v36, %v345_v25 }
 0x1b3   :  { %v403_v18 = vpop.permute.xlu0 %402  ;;  %v447_v48 = vsel %vm992_vm7, %v433_v20, -1e+30 }
 0x1b4   :  { %v474_v43 = vmax.f32 %v466_v62, %v468_v41  ;;  %v467_v45 = vmax.f32 %v423_v37, %v425_v14  ;;  %v469_v60 = vmax.f32 %v427_v35, %v429_v39  ;;  %v430_v61 = vadd.f32 %v403_v18, %v941_v59 }
 0x1b5   :  { %v405_v24 = vpop.permute.xlu1 %404 }
 0x1b6   :  { %v475_v46 = vmax.f32 %v467_v45, %v469_v60  ;;  %v470_v47 = vmax.f32 %v430_v61, %v446_v3  ;;  %v431_v31 = vadd.f32 %v405_v24, %v936_v57  ;;  %v613_v57 = vld [vmem:[%s1027_s2 + $0x2] ss:$0 sm:$0xff] }
 0x1b8   :  { %v476_v49 = vmax.f32 %v470_v47, %v472_v19  ;;  %v471_v50 = vmax.f32 %v431_v31, %v447_v48 }
 0x1ba   :  { %v478_v9 = vmax.f32 %v474_v43, %v476_v49  ;;  %v477_v51 = vmax.f32 %v471_v50, %v473_v26 }
 0x1bc   :  { %v485_v59 = vadd.f32 %v612_v58, %v478_v9  ;;  %v479_v52 = vmax.f32 %v475_v46, %v477_v51 }
 0x1be   :  { %v486_v21 = vadd.f32 %v612_v58, %v479_v52  ;;  %v487_v53 = vmax.f32 %v485_v59, 0.0 }
 0x1c0   :  { %v488_v55 = vmax.f32 %v486_v21, 0.0 }
 0x1c2   :  { %v489_v56 = vpack.c.bf16 %v488_v55, %v487_v53 }
 0x1c4   :  { %633 = vmatmul.mubr.msk.bf16.vlgmr.msra.gmra.mrb[12].mxu1 %vm527_vm8, %v489_v56 }
 0x297   :  { %v565_v16 = vpop.f32.mrb[12].mxu1 }
 0x298   :  { %v566_v25 = vadd.f32 %v613_v57, %v565_v16  ;;  %v634_v63 = vpop.f32.mrb[13].mxu1 }
 0x299   :  { %v568_v1 = vpop.f32.mrb[14].mxu1 }
 0x29a   :  { %572 = vst [vmem:[#allocation7] sm:$0xff] %v566_v25  ;;  %v569_v2 = vadd.f32 %v613_v57, %v568_v1  ;;  %v635_v4 = vpop.f32.mrb[15].mxu1 }
 0x29c   :  { %573 = vst [vmem:[#allocation7 + $0x8] sm:$0xff] %v569_v2 }
 0x29d   :  { %723 = shalt.err (!%p720_p6)
}
 0x29e   :  { %s724_s21 = scalar_lea.hbm %s1028_s3, 256 }
 0x29f   :  { %p725_p7 = scmp.ne.s32.totalorder %s1028_s3, %s724_s21  ;;  %p728_p8 = scmp.lt.u32.totalorder %s724_s21, %s1028_s3 }
 0x2a1   :  { %p730_p9 = pnand %p728_p8, %p725_p7 }
 0x2a3   :  { %733 = shalt.err (!%p730_p9)
}
 0x2a4   :  { %585 = dma.vmem_to_hbm [thread:$0]  %s580_s18, 256, %s1028_s3, [#allocation4], %s744_s0, %s744_s0, %s745_s9  }
 0x2a5   :  { %738 = dma.done.wait [#allocation4], 256  }
 0x2a6   :  { %739 = vsyncadd [#allocation4], 4294967040 }
 0x2a7   :  { %589 = vsyncpa [#allocation3], 1 }
 0x2a8   :  { %590 = vsyncpa [#allocation6], 1 }
 0x2a9   :  { %591 = vsyncpa [#allocation4], 1 }

</bundles_post_ra>
